<compile_context>
chip_gen: v7x
topology: tpu7x:2x2x1
jax: 0.10.0
libtpu: 0.0.40
codegen_flags: <defaults>
</compile_context>

<pallas_src>
import functools

import jax
import jax.numpy as jnp
from jax.experimental import pallas as pl
from jax.experimental.pallas import tpu as pltpu

LANES = 128  # output slab lane width -> unmasked full-lane stores


def hybrid_kernel(
    sigma_ref, x_ref, a_ref, p_ref,            # activations / graph structure
    w1_ref, b1_ref, w2_ref, b2_ref,            # GCNConv1 / GCNConv2 (bf16 W, f32 b)
    ws1_ref, bs1_ref, ws2_ref, bs2_ref,        # sigma encoder fc1 / fc2
    wf_s_ref, wf_m_ref, bf_ref,                # fusion weight split [H,H]+[H,H], bias
    wp_ref, bp_ref,                            # predict row [1,H] + scalar bias [1,1]
    out_ref,                                   # [B_pad, 128] lane-dense slab
):
    f32 = jnp.float32
    bf16 = jnp.bfloat16

    # ---- MolecularGCN (dropout = identity at inference) -----------------
    # GCNConv1: A_norm @ (X @ W1) + b1, ReLU.  bf16 on the MXU, f32 accumulate.
    h = jnp.dot(x_ref[...], w1_ref[...], preferred_element_type=f32)
    h = jnp.dot(a_ref[...], h.astype(bf16), preferred_element_type=f32) + b1_ref[...]
    h = jnp.maximum(h, 0.0)
    # GCNConv2: A_norm @ (h @ W2) + b2, ReLU
    h = jnp.dot(h.astype(bf16), w2_ref[...], preferred_element_type=f32)
    h = jnp.dot(a_ref[...], h.astype(bf16), preferred_element_type=f32) + b2_ref[...]
    h = jnp.maximum(h, 0.0)
    # global_mean_pool in f32 (exact 1/|graph| weights) -> [B_pad, H]
    mol = jnp.dot(p_ref[...], h, preferred_element_type=f32)

    # ---- SigmaProfileEncoder ---------------------------------------------
    s = jnp.dot(sigma_ref[...], ws1_ref[...], preferred_element_type=f32) + bs1_ref[...]
    s = jnp.maximum(s, 0.0)
    s = jnp.dot(s.astype(bf16), ws2_ref[...], preferred_element_type=f32) + bs2_ref[...]
    s = jnp.maximum(s, 0.0)

    # ---- Fusion: two MXU pushes into one f32 accumulator (no lane concat) --
    # Matches torch.cat([sigma_features, mol_features], dim=1) @ Wf:
    #   Wf[:H] multiplies the sigma half, Wf[H:] the molecular half.
    fused = (
        jnp.dot(s.astype(bf16), wf_s_ref[...], preferred_element_type=f32)
        + jnp.dot(mol.astype(bf16), wf_m_ref[...], preferred_element_type=f32)
        + bf_ref[...]
    )
    fused = jnp.maximum(fused, 0.0)

    # ---- Predict head: N=1 matmul as a VPU/XLU row reduction ---------------
    pred = jnp.sum(fused * wp_ref[...], axis=-1, keepdims=True) + bp_ref[...]  # [B_pad,1]

    # Lane-dense store: broadcast across 128 lanes -> unmasked vst.
    out_ref[...] = jnp.broadcast_to(pred, out_ref.shape)


def prepare_params(params, hidden):
    """One-time (init-time) bf16 cast + fusion-weight split.  Hoisted out of
    the per-call hot path per perf review."""
    bf16 = jnp.bfloat16
    return {
        "w1": params["w1"].astype(bf16), "b1": params["b1"],
        "w2": params["w2"].astype(bf16), "b2": params["b2"],
        "ws1": params["ws1"].astype(bf16), "bs1": params["bs1"],
        "ws2": params["ws2"].astype(bf16), "bs2": params["bs2"],
        # fusion weight split to avoid the lane-axis concat inside the kernel
        "wf_s": params["wf"][:hidden].astype(bf16),   # multiplies sigma features
        "wf_m": params["wf"][hidden:].astype(bf16),   # multiplies mol features
        "bf": params["bf"],
        "wp_row": params["wp_row"], "bp": params["bp"],
    }


@jax.jit
def hybrid_forward(sigma, x, a_norm, p_pool, p):
    """Fully jitted forward: padding, casts and the Pallas dispatch fuse into
    one executable (shapes are static under tracing)."""
    B = sigma.shape[0]
    N = x.shape[0]
    sigma_dim = sigma.shape[1]
    node_dim = x.shape[1]
    H = p["w1"].shape[1]
    B_pad = max(8, ((B + 7) // 8) * 8)  # pad batch rows to a sublane multiple

    bf16 = jnp.bfloat16
    sigma_p = jnp.zeros((B_pad, sigma_dim), bf16).at[:B].set(sigma.astype(bf16))
    # keep P_pool in f32 so the 1/|graph| mean-pool weights stay exact
    p_pool_p = jnp.zeros((B_pad, N), jnp.float32).at[:B].set(p_pool)

    args = (
        sigma_p, x.astype(bf16), a_norm.astype(bf16), p_pool_p,
        p["w1"], p["b1"], p["w2"], p["b2"],
        p["ws1"], p["bs1"], p["ws2"], p["bs2"],
        p["wf_s"], p["wf_m"], p["bf"],
        p["wp_row"], p["bp"],
    )

    # Advisory cost estimate (dominant terms: the two A@h matmuls).
    flops = (
        2 * N * node_dim * H        # X @ W1
        + 2 * N * N * H             # A @ (X W1)
        + 2 * N * H * H             # h @ W2
        + 2 * N * N * H             # A @ (h W2)
        + 2 * B_pad * N * H         # mean pool
        + 2 * B_pad * sigma_dim * 2 * H
        + 2 * B_pad * 2 * H * H     # sigma fc2
        + 2 * 2 * B_pad * H * H     # fusion (two dots)
        + 2 * B_pad * H             # predict reduction
    )
    bytes_accessed = sum(a.size * a.dtype.itemsize for a in args) + B_pad * LANES * 4
    cost = pl.CostEstimate(flops=flops, transcendentals=0,
                           bytes_accessed=bytes_accessed)

    vmem = pl.BlockSpec(memory_space=pltpu.MemorySpace.VMEM)
    out = pl.pallas_call(
        hybrid_kernel,
        out_shape=jax.ShapeDtypeStruct((B_pad, LANES), jnp.float32),
        in_specs=[vmem] * len(args),
        out_specs=vmem,
        cost_estimate=cost,
    )(*args)
    return out[:B, 0]  # matches prediction.squeeze()


def make_params(key, sigma_dim, node_dim, hidden):
    ks = jax.random.split(key, 12)
    n = lambda k, shape: (0.1 * jax.random.normal(k, shape)).astype(jnp.float32)
    return {
        # GCNConv weights stored as (in, out); bias broadcast as (1, out)
        "w1": n(ks[0], (node_dim, hidden)),  "b1": n(ks[1], (1, hidden)),
        "w2": n(ks[2], (hidden, hidden)),    "b2": n(ks[3], (1, hidden)),
        # sigma encoder
        "ws1": n(ks[4], (sigma_dim, 2 * hidden)), "bs1": n(ks[5], (1, 2 * hidden)),
        "ws2": n(ks[6], (2 * hidden, hidden)),    "bs2": n(ks[7], (1, hidden)),
        # fusion: concat([sigma_feat, mol_feat]) @ Wf, Wf = [2*hidden, hidden]
        "wf": n(ks[8], (2 * hidden, hidden)),
        "bf": n(ks[9], (1, hidden)),
        # predict: stored as a (1, hidden) row so the head is a reduction
        "wp_row": n(ks[10], (1, hidden)),
        "bp":     n(ks[11], (1, 1)),
    }


def build_graph(num_graphs, nodes_per_graph):
    """Batched ring graphs: GCN-normalized adjacency and mean-pool matrix."""
    N = num_graphs * nodes_per_graph
    A = jnp.zeros((N, N), jnp.float32)
    for g in range(num_graphs):
        off = g * nodes_per_graph
        for i in range(nodes_per_graph):
            j = (i + 1) % nodes_per_graph
            A = A.at[off + i, off + j].set(1.0)
            A = A.at[off + j, off + i].set(1.0)
    A_hat = A + jnp.eye(N, dtype=jnp.float32)
    deg = jnp.sum(A_hat, axis=1)
    d_inv_sqrt = 1.0 / jnp.sqrt(deg)
    a_norm = d_inv_sqrt[:, None] * A_hat * d_inv_sqrt[None, :]

    batch = jnp.repeat(jnp.arange(num_graphs), nodes_per_graph)
    p_pool = (batch[None, :] == jnp.arange(num_graphs)[:, None]).astype(jnp.float32)
    p_pool = p_pool / jnp.sum(p_pool, axis=1, keepdims=True)
    return a_norm, p_pool


if __name__ == "__main__":
    B = 2                 # number of graphs / sigma profiles in the batch
    sigma_dim = 16        # sigma_feature_dim
    node_dim = 8          # node_feature_dim
    hidden = 32           # hidden_dim
    nodes_per_graph = 8
    N = B * nodes_per_graph

    key = jax.random.PRNGKey(0)
    k_sigma, k_x, k_p = jax.random.split(key, 3)

    sigma_data = jax.random.normal(k_sigma, (B, sigma_dim), dtype=jnp.float32)
    node_feats = jax.random.normal(k_x, (N, node_dim), dtype=jnp.float32)
    a_norm, p_pool = build_graph(B, nodes_per_graph)

    params = make_params(k_p, sigma_dim, node_dim, hidden)
    params_dev = prepare_params(params, hidden)   # one-time bf16 cast + wf split

    pred = hybrid_forward(sigma_data, node_feats, a_norm, p_pool, params_dev)
    pred = jax.block_until_ready(pred)
    assert pred.shape == (B,)
    assert bool(jnp.all(jnp.isfinite(pred)))
    print("KERNEL_OK")
</pallas_src>

<mosaic_0001>
module attributes {stable_mosaic.version = 11 : i64} {
  func.func @hybrid_kernel(%arg0: memref<8x16xbf16, #tpu.memory_space<vmem>>, %arg1: memref<16x8xbf16, #tpu.memory_space<vmem>>, %arg2: memref<16x16xbf16, #tpu.memory_space<vmem>>, %arg3: memref<8x16xf32, #tpu.memory_space<vmem>>, %arg4: memref<8x32xbf16, #tpu.memory_space<vmem>>, %arg5: memref<1x32xf32, #tpu.memory_space<vmem>>, %arg6: memref<32x32xbf16, #tpu.memory_space<vmem>>, %arg7: memref<1x32xf32, #tpu.memory_space<vmem>>, %arg8: memref<16x64xbf16, #tpu.memory_space<vmem>>, %arg9: memref<1x64xf32, #tpu.memory_space<vmem>>, %arg10: memref<64x32xbf16, #tpu.memory_space<vmem>>, %arg11: memref<1x32xf32, #tpu.memory_space<vmem>>, %arg12: memref<32x32xbf16, #tpu.memory_space<vmem>>, %arg13: memref<32x32xbf16, #tpu.memory_space<vmem>>, %arg14: memref<1x32xf32, #tpu.memory_space<vmem>>, %arg15: memref<1x32xf32, #tpu.memory_space<vmem>>, %arg16: memref<1x1xf32, #tpu.memory_space<vmem>>, %arg17: memref<8x128xf32, #tpu.memory_space<vmem>>) attributes {dimension_semantics = [], scalar_prefetch = 0 : i64, scratch_operands = 0 : i64, tpu.core_type = #tpu.core_type<tc>} {
    %c0 = arith.constant 0 : index
    %c0_0 = arith.constant 0 : index
    %0 = vector.load %arg1[%c0, %c0_0] : memref<16x8xbf16, #tpu.memory_space<vmem>>, vector<16x8xbf16>
    %c0_1 = arith.constant 0 : index
    %c0_2 = arith.constant 0 : index
    %1 = vector.load %arg4[%c0_1, %c0_2] : memref<8x32xbf16, #tpu.memory_space<vmem>>, vector<8x32xbf16>
    %cst = arith.constant dense<0.000000e+00> : vector<16x32xf32>
    %2 = tpu.matmul %0, %1, %cst {dimension_numbers = #tpu.dot_dimension_numbers<[1], [0], [0], [1], [0, 0, 1, 1], [], []>} : vector<16x8xbf16>, vector<8x32xbf16>, vector<16x32xf32> -> vector<16x32xf32>
    %c0_3 = arith.constant 0 : index
    %c0_4 = arith.constant 0 : index
    %3 = vector.load %arg2[%c0_3, %c0_4] : memref<16x16xbf16, #tpu.memory_space<vmem>>, vector<16x16xbf16>
    %4 = arith.truncf %2 : vector<16x32xf32> to vector<16x32xbf16>
    %cst_5 = arith.constant dense<0.000000e+00> : vector<16x32xf32>
    %5 = tpu.matmul %3, %4, %cst_5 {dimension_numbers = #tpu.dot_dimension_numbers<[1], [0], [0], [1], [0, 0, 1, 1], [], []>} : vector<16x16xbf16>, vector<16x32xbf16>, vector<16x32xf32> -> vector<16x32xf32>
    %c0_6 = arith.constant 0 : index
    %c0_7 = arith.constant 0 : index
    %6 = vector.load %arg5[%c0_6, %c0_7] : memref<1x32xf32, #tpu.memory_space<vmem>>, vector<1x32xf32>
    %7 = vector.broadcast %6 : vector<1x32xf32> to vector<16x32xf32>
    %8 = arith.addf %5, %7 : vector<16x32xf32>
    %cst_8 = arith.constant 0.000000e+00 : f32
    %9 = vector.broadcast %cst_8 : f32 to vector<16x32xf32>
    %10 = arith.maximumf %8, %9 : vector<16x32xf32>
    %11 = arith.truncf %10 : vector<16x32xf32> to vector<16x32xbf16>
    %c0_9 = arith.constant 0 : index
    %c0_10 = arith.constant 0 : index
    %12 = vector.load %arg6[%c0_9, %c0_10] : memref<32x32xbf16, #tpu.memory_space<vmem>>, vector<32x32xbf16>
    %cst_11 = arith.constant dense<0.000000e+00> : vector<16x32xf32>
    %13 = tpu.matmul %11, %12, %cst_11 {dimension_numbers = #tpu.dot_dimension_numbers<[1], [0], [0], [1], [0, 0, 1, 1], [], []>} : vector<16x32xbf16>, vector<32x32xbf16>, vector<16x32xf32> -> vector<16x32xf32>
    %c0_12 = arith.constant 0 : index
    %c0_13 = arith.constant 0 : index
    %14 = vector.load %arg2[%c0_12, %c0_13] : memref<16x16xbf16, #tpu.memory_space<vmem>>, vector<16x16xbf16>
    %15 = arith.truncf %13 : vector<16x32xf32> to vector<16x32xbf16>
    %cst_14 = arith.constant dense<0.000000e+00> : vector<16x32xf32>
    %16 = tpu.matmul %14, %15, %cst_14 {dimension_numbers = #tpu.dot_dimension_numbers<[1], [0], [0], [1], [0, 0, 1, 1], [], []>} : vector<16x16xbf16>, vector<16x32xbf16>, vector<16x32xf32> -> vector<16x32xf32>
    %c0_15 = arith.constant 0 : index
    %c0_16 = arith.constant 0 : index
    %17 = vector.load %arg7[%c0_15, %c0_16] : memref<1x32xf32, #tpu.memory_space<vmem>>, vector<1x32xf32>
    %18 = vector.broadcast %17 : vector<1x32xf32> to vector<16x32xf32>
    %19 = arith.addf %16, %18 : vector<16x32xf32>
    %cst_17 = arith.constant 0.000000e+00 : f32
    %20 = vector.broadcast %cst_17 : f32 to vector<16x32xf32>
    %21 = arith.maximumf %19, %20 : vector<16x32xf32>
    %c0_18 = arith.constant 0 : index
    %c0_19 = arith.constant 0 : index
    %22 = vector.load %arg3[%c0_18, %c0_19] : memref<8x16xf32, #tpu.memory_space<vmem>>, vector<8x16xf32>
    %cst_20 = arith.constant dense<0.000000e+00> : vector<8x32xf32>
    %23 = tpu.matmul %22, %21, %cst_20 {dimension_numbers = #tpu.dot_dimension_numbers<[1], [0], [0], [1], [0, 0, 1, 1], [], []>} : vector<8x16xf32>, vector<16x32xf32>, vector<8x32xf32> -> vector<8x32xf32>
    %c0_21 = arith.constant 0 : index
    %c0_22 = arith.constant 0 : index
    %24 = vector.load %arg0[%c0_21, %c0_22] : memref<8x16xbf16, #tpu.memory_space<vmem>>, vector<8x16xbf16>
    %c0_23 = arith.constant 0 : index
    %c0_24 = arith.constant 0 : index
    %25 = vector.load %arg8[%c0_23, %c0_24] : memref<16x64xbf16, #tpu.memory_space<vmem>>, vector<16x64xbf16>
    %cst_25 = arith.constant dense<0.000000e+00> : vector<8x64xf32>
    %26 = tpu.matmul %24, %25, %cst_25 {dimension_numbers = #tpu.dot_dimension_numbers<[1], [0], [0], [1], [0, 0, 1, 1], [], []>} : vector<8x16xbf16>, vector<16x64xbf16>, vector<8x64xf32> -> vector<8x64xf32>
    %c0_26 = arith.constant 0 : index
    %c0_27 = arith.constant 0 : index
    %27 = vector.load %arg9[%c0_26, %c0_27] : memref<1x64xf32, #tpu.memory_space<vmem>>, vector<1x64xf32>
    %28 = vector.broadcast %27 : vector<1x64xf32> to vector<8x64xf32>
    %29 = arith.addf %26, %28 : vector<8x64xf32>
    %cst_28 = arith.constant 0.000000e+00 : f32
    %30 = vector.broadcast %cst_28 : f32 to vector<8x64xf32>
    %31 = arith.maximumf %29, %30 : vector<8x64xf32>
    %32 = arith.truncf %31 : vector<8x64xf32> to vector<8x64xbf16>
    %c0_29 = arith.constant 0 : index
    %c0_30 = arith.constant 0 : index
    %33 = vector.load %arg10[%c0_29, %c0_30] : memref<64x32xbf16, #tpu.memory_space<vmem>>, vector<64x32xbf16>
    %cst_31 = arith.constant dense<0.000000e+00> : vector<8x32xf32>
    %34 = tpu.matmul %32, %33, %cst_31 {dimension_numbers = #tpu.dot_dimension_numbers<[1], [0], [0], [1], [0, 0, 1, 1], [], []>} : vector<8x64xbf16>, vector<64x32xbf16>, vector<8x32xf32> -> vector<8x32xf32>
    %c0_32 = arith.constant 0 : index
    %c0_33 = arith.constant 0 : index
    %35 = vector.load %arg11[%c0_32, %c0_33] : memref<1x32xf32, #tpu.memory_space<vmem>>, vector<1x32xf32>
    %36 = vector.broadcast %35 : vector<1x32xf32> to vector<8x32xf32>
    %37 = arith.addf %34, %36 : vector<8x32xf32>
    %cst_34 = arith.constant 0.000000e+00 : f32
    %38 = vector.broadcast %cst_34 : f32 to vector<8x32xf32>
    %39 = arith.maximumf %37, %38 : vector<8x32xf32>
    %40 = arith.truncf %39 : vector<8x32xf32> to vector<8x32xbf16>
    %c0_35 = arith.constant 0 : index
    %c0_36 = arith.constant 0 : index
    %41 = vector.load %arg12[%c0_35, %c0_36] : memref<32x32xbf16, #tpu.memory_space<vmem>>, vector<32x32xbf16>
    %cst_37 = arith.constant dense<0.000000e+00> : vector<8x32xf32>
    %42 = tpu.matmul %40, %41, %cst_37 {dimension_numbers = #tpu.dot_dimension_numbers<[1], [0], [0], [1], [0, 0, 1, 1], [], []>} : vector<8x32xbf16>, vector<32x32xbf16>, vector<8x32xf32> -> vector<8x32xf32>
    %43 = arith.truncf %23 : vector<8x32xf32> to vector<8x32xbf16>
    %c0_38 = arith.constant 0 : index
    %c0_39 = arith.constant 0 : index
    %44 = vector.load %arg13[%c0_38, %c0_39] : memref<32x32xbf16, #tpu.memory_space<vmem>>, vector<32x32xbf16>
    %cst_40 = arith.constant dense<0.000000e+00> : vector<8x32xf32>
    %45 = tpu.matmul %43, %44, %cst_40 {dimension_numbers = #tpu.dot_dimension_numbers<[1], [0], [0], [1], [0, 0, 1, 1], [], []>} : vector<8x32xbf16>, vector<32x32xbf16>, vector<8x32xf32> -> vector<8x32xf32>
    %46 = arith.addf %42, %45 : vector<8x32xf32>
    %c0_41 = arith.constant 0 : index
    %c0_42 = arith.constant 0 : index
    %47 = vector.load %arg14[%c0_41, %c0_42] : memref<1x32xf32, #tpu.memory_space<vmem>>, vector<1x32xf32>
    %48 = vector.broadcast %47 : vector<1x32xf32> to vector<8x32xf32>
    %49 = arith.addf %46, %48 : vector<8x32xf32>
    %cst_43 = arith.constant 0.000000e+00 : f32
    %50 = vector.broadcast %cst_43 : f32 to vector<8x32xf32>
    %51 = arith.maximumf %49, %50 : vector<8x32xf32>
    %c0_44 = arith.constant 0 : index
    %c0_45 = arith.constant 0 : index
    %52 = vector.load %arg15[%c0_44, %c0_45] : memref<1x32xf32, #tpu.memory_space<vmem>>, vector<1x32xf32>
    %53 = vector.broadcast %52 : vector<1x32xf32> to vector<8x32xf32>
    %54 = arith.mulf %51, %53 : vector<8x32xf32>
    %cst_46 = arith.constant dense<0.000000e+00> : vector<8xf32>
    %55 = vector.multi_reduction <add>, %54, %cst_46 [1] : vector<8x32xf32> to vector<8xf32>
    %56 = vector.shape_cast %55 : vector<8xf32> to vector<8x1xf32>
    %c0_47 = arith.constant 0 : index
    %c0_48 = arith.constant 0 : index
    %57 = vector.load %arg16[%c0_47, %c0_48] : memref<1x1xf32, #tpu.memory_space<vmem>>, vector<1x1xf32>
    %58 = vector.broadcast %57 : vector<1x1xf32> to vector<8x1xf32>
    %59 = arith.addf %56, %58 : vector<8x1xf32>
    %60 = vector.shape_cast %59 : vector<8x1xf32> to vector<8x1xf32>
    %61 = vector.broadcast %60 : vector<8x1xf32> to vector<8x128xf32>
    %c0_49 = arith.constant 0 : index
    %c0_50 = arith.constant 0 : index
    %62 = vector.load %arg17[%c0_49, %c0_50] : memref<8x128xf32, #tpu.memory_space<vmem>>, vector<8x128xf32>
    tpu.vector_store %arg17[%c0_49, %c0_50], %61 {strides = array<i32>} : memref<8x128xf32, #tpu.memory_space<vmem>>, vector<8x128xf32>,
    return
  }
}

</mosaic_0001>

<bundles_post_ra>
// kernel: hybrid_forward.1
= control target key start
LH: loop header
LB: loop body
LE: loop exit
PB: predicated region body
PF: predicated region fallthrough
CT: control target
= control target key end

     0   :  { %vm71_vm0 = vcmask 1043456   ;;  %v810_v0 = vmov 0.0   ;;  %vm811_vm1 = vmmov 0   ;;  %vm67_vm2 = vcmask 64512   ;;  %s1016_s4 = inlined_call_operand.vmem [shape: bf16[8,32], index: 4, kind: input, shape index: {}]   ;;  %s1017_s1 = inlined_call_operand.vmem [shape: bf16[16,8], index: 1, kind: input, shape index: {}]   ;;  %s1018_s2 = inlined_call_operand.vmem [shape: bf16[16,16], index: 2, kind: input, shape index: {}]   ;;  %s1019_s6 = inlined_call_operand.vmem [shape: bf16[32,32], index: 6, kind: input, shape index: {}]   ;;  %s1020_s5 = inlined_call_operand.vmem [shape: f32[1,32], index: 5, kind: input, shape index: {}]   ;;  %s1021_s8 = inlined_call_operand.vmem [shape: bf16[16,64], index: 8, kind: input, shape index: {}]   ;;  %s1022_s0 = inlined_call_operand.vmem [shape: bf16[8,16], index: 0, kind: input, shape index: {}]   ;;  %s1023_s10 = inlined_call_operand.vmem [shape: bf16[64,32], index: 10, kind: input, shape index: {}]   ;;  %s1024_s13 = inlined_call_operand.vmem [shape: bf16[32,32], index: 13, kind: input, shape index: {}]   ;;  %s1025_s7 = inlined_call_operand.vmem [shape: f32[1,32], index: 7, kind: input, shape index: {}]   ;;  %s1026_s3 = inlined_call_operand.vmem [shape: f32[8,16], index: 3, kind: input, shape index: {}]   ;;  %s1027_s9 = inlined_call_operand.vmem [shape: f32[1,64], index: 9, kind: input, shape index: {}]   ;;  %s1028_s12 = inlined_call_operand.vmem [shape: bf16[32,32], index: 12, kind: input, shape index: {}]   ;;  %s1029_s11 = inlined_call_operand.vmem [shape: f32[1,32], index: 11, kind: input, shape index: {}]   ;;  %s1030_s16 = inlined_call_operand.<no memory space> [shape: f32[1,1], index: 16, kind: input, shape index: {}]   ;;  %s1031_s14 = inlined_call_operand.vmem [shape: f32[1,32], index: 14, kind: input, shape index: {}]   ;;  %s1032_s15 = inlined_call_operand.vmem [shape: f32[1,32], index: 15, kind: input, shape index: {}]   ;;  %s1033_s17 = inlined_call_operand.vmem [shape: f32[8,128], index: 17, kind: output, shape index: {}]  }
   0x1   :  { %1034 = sst [smem:[#allocation3_spill]] %s1016_s4  ;;  %722 = vmatprep.subr.bf16.mxu0 %v810_v0  ;;  %724 = vmatprep.mubr.msk.bf16.mxu0 %vm811_vm1, %v810_v0  ;;  %v798_v9 = vld [vmem:[%s1018_s2] sm:$0xff]   ;;  %vm131_vm3 = vcmask 130048   ;;  %v800_v11 = vld [vmem:[%s1019_s6 + $0x8] sm:$0xff]   ;;  %vm195_vm4 = vcmask 261120   ;;  %v812_v29 = vmov 0.0|0.0  }
   0x2   :  { %1035 = sst [smem:[#allocation4_spill]] %s1017_s1  ;;  %s1036_s26 = sld [smem:[#allocation3_spill]]  ;;  %728 = vmatprep.subr.bf16.mxu1 %v810_v0  ;;  %730 = vmatprep.mubr.msk.bf16.mxu1 %vm811_vm1, %v810_v0  ;;  %v799_v10 = vld [vmem:[%s1019_s6] sm:$0xff]   ;;  %v803_v47 = vld [vmem:[%s1023_s10 + $0x8] sm:$0xff]   ;;  %v804_v50 = vld [vmem:[%s1023_s10 + $0x10] sm:$0xff]   ;;  %vm465_vm5 = vcmask 523264  }
   0x3   :  { %s1037_s29 = sld [smem:[#allocation4_spill]]  ;;  %v670_v12 = vld [vmem:[%s1020_s5] ss:$0 sm:$0xff]  ;;  %v805_v52 = vld [vmem:[%s1023_s10 + $0x18] sm:$0xff]   ;;  %v807_v54 = vld [vmem:[%s1024_s13 + $0x8] sm:$0xff]  }
   0x4   :  { %v801_v27 = vld [vmem:[%s1021_s8] sm:$0xff]   ;;  %v809_v59 = vld [vmem:[%s1028_s12 + $0x8] sm:$0xff]  }
   0x5   :  { %v365_v28 = vld [vmem:[%s1022_s0] sm:$0xf] }
   0x6   :  { %v806_v30 = vld [vmem:[%s1024_s13] sm:$0xff]  }
   0x7   :  { %v676_v31 = vld [vmem:[%s1025_s7] ss:$0 sm:$0xff] }
   0x8   :  { %v61_v1 = vld [vmem:[%s1036_s26] sm:$0xf] }
   0x9   :  { %v73_v2 = vsel %vm71_vm0, %v61_v1, 0  ;;  %v797_v3 = vld [vmem:[%s1037_s29] sm:$0xff]  }
   0xa   :  { %723 = vmatpush3.bf16.msra.mxu0 %v73_v2  ;;  %v291_v42 = vld [vmem:[%s1026_s3] sm:$0xff] }
   0xb   :  { %734 = vmatprep.subr.bf16.mxu0 %v810_v0  ;;  %v802_v43 = vld [vmem:[%s1023_s10] sm:$0xff]  }
   0xc   :  { %v679_v48 = vld [vmem:[%s1027_s9] ss:$0 sm:$0xff] }
   0xd   :  { %725 = vmatmul.mubr.msk.bf16.vlgmr.msra.gmra.mrb[0].mxu0 %vm67_vm2, %v797_v3  ;;  %v808_v56 = vld [vmem:[%s1028_s12] sm:$0xff]  }
   0xe   :  { %738 = vmatprep.mubr.msk.bf16.mxu0 %vm811_vm1, %v810_v0  ;;  %735 = vmatpush3.bf16.msra.mxu0 %v799_v10  ;;  %v682_v60 = vld [vmem:[%s1029_s11] ss:$0 sm:$0xff] }
   0xf   :  { %736 = vmatprep.subr.bf16.mxu0 %v810_v0  ;;  %v694_v10 = vld [vmem:[%s1031_s14] ss:$0 sm:$0xff] }
  0x12   :  { %737 = vmatpush3.bf16.msra.mxu0 %v800_v11 }
  0x13   :  { %789 = vmatprep.subr.bf16.mxu0 %v812_v29 }
  0xe0   :  { %v109_v4 = vpop.f32.mrb[0].mxu0 }
  0xe1   :  { %v726_v5 = vpop.f32.mrb[1].mxu0 }
  0xe2   :  { %v112_v6 = vpop.f32.mrb[2].mxu0  ;;  %v22_v5 = vstv %s1030_s16 }
  0xe3   :  { %v118_v7 = vpack.c.bf16 %v112_v6, %v109_v4  ;;  %v727_v8 = vpop.f32.mrb[3].mxu0  ;;  %23 = vst [vmem:[#allocation2] sm:$0x1] %v22_v5 }
  0xe5   :  { %729 = vmatpush3.bf16.msra.mxu1 %v118_v7 }
  0xe6   :  { %742 = vmatprep.subr.bf16.mxu1 %v810_v0 }
  0xe8   :  { %731 = vmatmul.mubr.msk.bf16.vlgmr.msra.gmra.mrb[0].mxu1 %vm131_vm3, %v798_v9 }
  0xe9   :  { %744 = vmatprep.mubr.msk.bf16.mxu1 %vm811_vm1, %v810_v0 }
 0x1bb   :  { %v169_v13 = vpop.f32.mrb[0].mxu1 }
 0x1bc   :  { %v170_v14 = vadd.f32 %v670_v12, %v169_v13  ;;  %v732_v15 = vpop.f32.mrb[1].mxu1 }
 0x1bd   :  { %v172_v16 = vpop.f32.mrb[2].mxu1 }
 0x1be   :  { %v173_v17 = vadd.f32 %v670_v12, %v172_v16  ;;  %v733_v18 = vpop.f32.mrb[3].mxu1  ;;  %v176_v19 = vmax.f32 %v170_v14, 0.0  ;;  %v695_v16 = vld [vmem:[%s1032_s15] ss:$0 sm:$0xff] }
 0x1c0   :  { %v177_v20 = vmax.f32 %v173_v17, 0.0 }
 0x1c2   :  { %v178_v21 = vpack.c.bf16 %v177_v20, %v176_v19  ;;  %v813_v20 = vmov 0  }
 0x1c3   :  { %796 = vset.pattern.permute.xlu0 %v813_v20 }
 0x1c4   :  { %739 = vmatmul.mubr.msk.bf16.vlgmr.msra.gmra.mrb[4].mxu0 %vm195_vm4, %v178_v21  ;;  %v696_v21 = vld [vmem:[#allocation2] ss:$0 sm:$0xff] }
 0x1c5   :  { %752 = vmatprep.mubr.msk.f32.mxu0 %vm811_vm1, %v810_v0 }
 0x297   :  { %v233_v22 = vpop.f32.mrb[4].mxu0 }
 0x298   :  { %v740_v23 = vpop.f32.mrb[5].mxu0 }
 0x299   :  { %v236_v24 = vpop.f32.mrb[6].mxu0 }
 0x29a   :  { %v240_v25 = vpack.c.bf16 %v236_v24, %v233_v22  ;;  %v741_v26 = vpop.f32.mrb[7].mxu0 }
 0x29c   :  { %743 = vmatpush3.bf16.msra.mxu1 %v240_v25 }
 0x29d   :  { %755 = vmatprep.subr.bf16.mxu1 %v810_v0 }
 0x29f   :  { %745 = vmatmul.mubr.msk.bf16.vlgmr.msra.gmra.mrb[4].mxu1 %vm131_vm3, %v798_v9 }
 0x2a0   :  { %756 = vmatpush3.bf16.msra.mxu1 %v801_v27  ;;  %757 = vmatprep.mubr.msk.bf16.mxu1 %vm811_vm1, %v810_v0 }
 0x2a1   :  { %773 = vmatprep.subr.bf16.mxu1 %v810_v0 }
 0x2a7   :  { %758 = vmatmul.mubr.msk.bf16.vlgmr.msra.gmra.mrb[8].mxu1 %vm131_vm3, %v365_v28 }
 0x2a8   :  { %777 = vmatprep.mubr.msk.bf16.mxu1 %vm811_vm1, %v810_v0  ;;  %774 = vmatpush3.bf16.msra.mxu1 %v806_v30 }
 0x2a9   :  { %775 = vmatprep.subr.bf16.mxu1 %v810_v0 }
 0x2ac   :  { %776 = vmatpush3.bf16.msra.mxu1 %v807_v54 }
 0x2ad   :  { %781 = vmatprep.subr.bf16.mxu1 %v810_v0 }
 0x372   :  { %v282_v32 = vpop.f32.mrb[4].mxu1 }
 0x373   :  { %v283_v33 = vadd.f32 %v676_v31, %v282_v32  ;;  %v746_v34 = vpop.f32.mrb[5].mxu1 }
 0x374   :  { %v285_v35 = vpop.f32.mrb[6].mxu1 }
 0x375   :  { %v286_v36 = vadd.f32 %v676_v31, %v285_v35  ;;  %v747_v37 = vpop.f32.mrb[7].mxu1  ;;  %v289_v38 = vmax.f32 %v283_v33, 0.0 }
 0x377   :  { %v290_v39 = vmax.f32 %v286_v36, 0.0 }
 0x379   :  { %v790_v40 = vpack.c.bf16 %v290_v39, %v289_v38 }
 0x37a   :  { %v418_v41 = vpop.f32.mrb[8].mxu1 }
 0x37b   :  { %791 = vmatpush3.bf16.msra.mxu0 %v790_v40  ;;  %v759_v44 = vpop.f32.mrb[9].mxu1  ;;  %v419_v49 = vadd.f32 %v679_v48, %v418_v41 }
 0x37c   :  { %761 = vmatprep.subr.bf16.mxu0 %v810_v0  ;;  %v421_v45 = vpop.f32.mrb[10].mxu1 }
 0x37d   :  { %v760_v46 = vpop.f32.mrb[11].mxu1  ;;  %v424_v51 = vmax.f32 %v419_v49, 0.0 }
 0x37e   :  { %753 = vmatmul.mubr.msk.f32.vlgmr.msra.gmra.mrb[8].mxu0 %vm131_vm3, %v291_v42 }
 0x37f   :  { %762 = vmatpush3.bf16.msra.mxu0 %v802_v43  ;;  %769 = vmatprep.mubr.msk.bf16.mxu0 %vm811_vm1, %v810_v0  ;;  %v425_v53 = vpack.c.bf16 %v424_v51, %v424_v51 }
 0x380   :  { %763 = vmatprep.subr.bf16.mxu0 %v810_v0 }
 0x383   :  { %764 = vmatpush3.bf16.msra.mxu0 %v803_v47 }
 0x384   :  { %765 = vmatprep.subr.bf16.mxu0 %v810_v0 }
 0x387   :  { %766 = vmatpush3.bf16.msra.mxu0 %v804_v50 }
 0x388   :  { %767 = vmatprep.subr.bf16.mxu0 %v810_v0 }
 0x38b   :  { %768 = vmatpush3.bf16.msra.mxu0 %v805_v52 }
 0x38e   :  { %770 = vmatmul.mubr.msk.bf16.vlgmr.msra.gmra.mrb[12].mxu0 %vm465_vm5, %v425_v53 }
 0x451   :  { %v361_v55 = vpop.f32.mrb[8].mxu0 }
 0x452   :  { %v515_v57 = vpack.c.bf16 %v361_v55, %v361_v55  ;;  %v754_v58 = vpop.f32.mrb[9].mxu0 }
 0x454   :  { %778 = vmatmul.mubr.msk.bf16.vlgmr.msra.gmra.mrb[12].mxu1 %vm195_vm4, %v515_v57 }
 0x455   :  { %782 = vmatpush3.bf16.msra.mxu1 %v808_v56  ;;  %785 = vmatprep.mubr.msk.bf16.mxu1 %vm811_vm1, %v810_v0 }
 0x456   :  { %783 = vmatprep.subr.bf16.mxu1 %v810_v0 }
 0x459   :  { %784 = vmatpush3.bf16.msra.mxu1 %v809_v59 }
 0x461   :  { %v503_v61 = vpop.f32.mrb[12].mxu0 }
 0x462   :  { %v504_v62 = vadd.f32 %v682_v60, %v503_v61  ;;  %v771_v63 = vpop.f32.mrb[13].mxu0 }
 0x463   :  { %v506_v1 = vpop.f32.mrb[14].mxu0 }
 0x464   :  { %v509_v2 = vmax.f32 %v504_v62, 0.0  ;;  %v772_v3 = vpop.f32.mrb[15].mxu0 }
 0x466   :  { %v510_v4 = vpack.c.bf16 %v509_v2, %v509_v2 }
 0x468   :  { %786 = vmatmul.mubr.msk.bf16.vlgmr.msra.gmra.mrb[16].mxu1 %vm195_vm4, %v510_v4 }
 0x527   :  { %v569_v0 = vpop.f32.mrb[12].mxu1 }
 0x528   :  { %v779_v6 = vpop.f32.mrb[13].mxu1 }
 0x529   :  { %v572_v7 = vpop.f32.mrb[14].mxu1 }
 0x52a   :  { %v780_v8 = vpop.f32.mrb[15].mxu1 }
 0x53b   :  { %v624_v9 = vpop.f32.mrb[16].mxu1 }
 0x53c   :  { %v625_v11 = vadd.f32 %v624_v9, %v569_v0  ;;  %v787_v12 = vpop.f32.mrb[17].mxu1 }
 0x53d   :  { %v627_v13 = vpop.f32.mrb[18].mxu1 }
 0x53e   :  { %v637_v14 = vadd.f32 %v694_v10, %v625_v11  ;;  %v788_v15 = vpop.f32.mrb[19].mxu1 }
 0x540   :  { %v638_v17 = vmax.f32 %v637_v14, 0.0 }
 0x542   :  { %v646_v18 = vmul.f32 %v695_v16, %v638_v17 }
 0x544   :  { %v647_v19 = vsel %vm195_vm4, %v646_v18, 0.0 }
 0x545   :  { %648 = vadd.xlane.f32.xlu0 %v647_v19 }
 0x5d2   :  { %v649_v22 = vpop.xlane.xlu0 %648 }
 0x5d3   :  { %v657_v23 = vadd.f32 %v696_v21, %v649_v22 }
 0x5d5   :  { %660 = vperm.xlu0 %796, %v657_v23  }
 0x654   :  { %v661_v24 = vpop.permute.xlu0 %660 }
 0x655   :  { %663 = vst [vmem:[%s1033_s17] sm:$0xff] %v661_v24 }

</bundles_post_ra>
